<compile_context>
chip_gen: v5e
topology: v5e:2x2
jax: 0.10.0
libtpu: 0.0.40
codegen_flags: <defaults>
</compile_context>

<pallas_src>
import functools

import jax
import jax.numpy as jnp
from jax.experimental import pallas as pl
from jax.experimental.pallas import tpu as pltpu

VP = 128          # padded vocab width (lane-friendly)
NEG_INF = -1e30   # finite "minus infinity"; representable in bf16, safe under 0 * NEG_INF


def pad_embedding_table(table, vocab_size, vp=VP):
    """Pad a (V, V) table to (vp, vp) with NEG_INF in the padded columns.

    Call ONCE (at model init / after each optimizer step), not per forward.
    """
    table_pad = jnp.full((vp, vp), NEG_INF, dtype=jnp.float32)
    return table_pad.at[:vocab_size, :vocab_size].set(table.astype(jnp.float32))


# ---------------------------------------------------------------------------
# Kernel bodies
# ---------------------------------------------------------------------------

def _gather_logits(idx_ref, table_ref, col):
    """Embedding lookup as one_hot @ table on the MXU (exact f32 row selection)."""
    one_hot = (col == idx_ref[...]).astype(jnp.float32)                  # (tile, VP)
    return jnp.dot(one_hot, table_ref[...], preferred_element_type=jnp.float32)


def _tile_mean_ce(logits, tgt_ref, col):
    """Per-token CE from f32 logits, reduced to a per-tile mean and broadcast to a
    lane-dense (8, VP) block so the store is a single unmasked vst."""
    tile, vp = logits.shape
    m = jnp.max(logits, axis=-1, keepdims=True)                          # (tile, 1)
    lse = m + jnp.log(jnp.sum(jnp.exp(logits - m), axis=-1, keepdims=True))
    tgt_logit = jnp.sum(jnp.where(col == tgt_ref[...], logits, jnp.float32(0.0)),
                        axis=-1, keepdims=True)                          # (tile, 1)
    per_token = lse - tgt_logit                                          # (tile, 1)
    tile_mean = jnp.sum(per_token, axis=0, keepdims=True) * jnp.float32(1.0 / tile)
    return jnp.broadcast_to(tile_mean, (8, vp))


def _loss_kernel(idx_ref, tgt_ref, table_ref, loss_ref):
    """Loss-only: no logits writeback at all (training fast path)."""
    tile = idx_ref.shape[0]
    vp = table_ref.shape[1]
    col = jax.lax.broadcasted_iota(jnp.int32, (tile, vp), 1)
    logits = _gather_logits(idx_ref, table_ref, col)
    loss_ref[...] = _tile_mean_ce(logits, tgt_ref, col)


def _logits_loss_kernel(idx_ref, tgt_ref, table_ref, logits_ref, loss_ref):
    """Logits (cast to logits_ref.dtype) + per-tile mean CE (computed from f32)."""
    tile = idx_ref.shape[0]
    vp = table_ref.shape[1]
    col = jax.lax.broadcasted_iota(jnp.int32, (tile, vp), 1)
    logits = _gather_logits(idx_ref, table_ref, col)
    loss_ref[...] = _tile_mean_ce(logits, tgt_ref, col)    # loss uses f32, before cast
    logits_ref[...] = logits.astype(logits_ref.dtype)


def _logits_kernel(idx_ref, table_ref, logits_ref):
    """Logits-only (targets=None inference path, used by generate())."""
    tile = idx_ref.shape[0]
    vp = table_ref.shape[1]
    col = jax.lax.broadcasted_iota(jnp.int32, (tile, vp), 1)
    logits_ref[...] = _gather_logits(idx_ref, table_ref, col).astype(logits_ref.dtype)


# ---------------------------------------------------------------------------
# Tiling
# ---------------------------------------------------------------------------

def _choose_tile(n, tile_n):
    """Largest multiple-of-8 divisor of n that is <= the cap.

    Cap = min(tile_n, n), additionally n // 2 once n is large enough so the
    ("parallel",) grid axis has >= 2 steps to feed both v7x TensorCores.
    Avoids the old gcd() cliff that could collapse the tile to 8.
    """
    cap = min(tile_n, n)
    if n >= 1024:
        cap = min(cap, n // 2)
    cap -= cap % 8
    for t in range(cap, 7, -8):
        if n % t == 0:
            return t
    return 8  # pathological N (e.g. 8 * large prime); consider padding N upstream.


def _flatten(idx, targets):
    b, t = idx.shape
    n = b * t
    assert n % 8 == 0, "B*T must be a multiple of 8 for clean sublane tiling"
    idx_flat = idx.reshape(n, 1).astype(jnp.int32)
    tgt_flat = None if targets is None else targets.reshape(n, 1).astype(jnp.int32)
    return n, idx_flat, tgt_flat


# ---------------------------------------------------------------------------
# Wrappers
# ---------------------------------------------------------------------------

@functools.partial(jax.jit, static_argnames=("tile_n",))
def bigram_loss(idx, targets, table_pad, *, tile_n=4096):
    """Scalar mean cross-entropy only: skips the logits HBM writeback entirely."""
    n, idx_flat, tgt_flat = _flatten(idx, targets)
    vp = table_pad.shape[1]
    tile = _choose_tile(n, tile_n)
    grid_n = n // tile

    loss_blocks = pl.pallas_call(
        _loss_kernel,
        grid=(grid_n,),
        in_specs=[
            pl.BlockSpec((tile, 1), lambda i: (i, 0)),     # idx tile
            pl.BlockSpec((tile, 1), lambda i: (i, 0)),     # target tile
            pl.BlockSpec((vp, vp), lambda i: (0, 0)),      # table: resident across grid
        ],
        out_specs=pl.BlockSpec((8, vp), lambda i: (i, 0)), # lane-dense per-tile mean
        out_shape=jax.ShapeDtypeStruct((grid_n * 8, vp), jnp.float32),
        compiler_params=pltpu.CompilerParams(dimension_semantics=("parallel",)),
        cost_estimate=pl.CostEstimate(
            flops=2 * n * vp * vp,
            transcendentals=n * (vp + 1),
            bytes_accessed=2 * n * 4 + vp * vp * 4 + grid_n * 8 * vp * 4,
        ),
    )(idx_flat, tgt_flat, table_pad)

    # Equal tile sizes -> mean of per-tile means == global mean.
    return jnp.mean(loss_blocks)


@functools.partial(jax.jit, static_argnames=("tile_n", "logits_dtype"))
def bigram_logits(idx, table_pad, *, tile_n=4096, logits_dtype=jnp.bfloat16):
    """Padded (B*T, 128) logits only (targets=None path)."""
    n, idx_flat, _ = _flatten(idx, None)
    vp = table_pad.shape[1]
    tile = _choose_tile(n, tile_n)
    grid_n = n // tile
    itemsize = jnp.dtype(logits_dtype).itemsize

    return pl.pallas_call(
        _logits_kernel,
        grid=(grid_n,),
        in_specs=[
            pl.BlockSpec((tile, 1), lambda i: (i, 0)),
            pl.BlockSpec((vp, vp), lambda i: (0, 0)),
        ],
        out_specs=pl.BlockSpec((tile, vp), lambda i: (i, 0)),
        out_shape=jax.ShapeDtypeStruct((n, vp), logits_dtype),
        compiler_params=pltpu.CompilerParams(dimension_semantics=("parallel",)),
        cost_estimate=pl.CostEstimate(
            flops=2 * n * vp * vp,
            transcendentals=0,
            bytes_accessed=n * 4 + vp * vp * 4 + n * vp * itemsize,
        ),
    )(idx_flat, table_pad)


@functools.partial(jax.jit, static_argnames=("tile_n", "logits_dtype"))
def _forward_with_loss(idx, targets, table_pad, *, tile_n, logits_dtype):
    n, idx_flat, tgt_flat = _flatten(idx, targets)
    vp = table_pad.shape[1]
    tile = _choose_tile(n, tile_n)
    grid_n = n // tile
    itemsize = jnp.dtype(logits_dtype).itemsize

    logits_pad, loss_blocks = pl.pallas_call(
        _logits_loss_kernel,
        grid=(grid_n,),
        in_specs=[
            pl.BlockSpec((tile, 1), lambda i: (i, 0)),
            pl.BlockSpec((tile, 1), lambda i: (i, 0)),
            pl.BlockSpec((vp, vp), lambda i: (0, 0)),
        ],
        out_specs=(
            pl.BlockSpec((tile, vp), lambda i: (i, 0)),    # lane-dense logits tile
            pl.BlockSpec((8, vp), lambda i: (i, 0)),       # lane-dense per-tile mean CE
        ),
        out_shape=(
            jax.ShapeDtypeStruct((n, vp), logits_dtype),
            jax.ShapeDtypeStruct((grid_n * 8, vp), jnp.float32),
        ),
        compiler_params=pltpu.CompilerParams(dimension_semantics=("parallel",)),
        cost_estimate=pl.CostEstimate(
            flops=2 * n * vp * vp,
            transcendentals=n * (vp + 1),
            bytes_accessed=2 * n * 4 + vp * vp * 4 + n * vp * itemsize + grid_n * 8 * vp * 4,
        ),
    )(idx_flat, tgt_flat, table_pad)

    return logits_pad, jnp.mean(loss_blocks)


def bigram_forward(idx, targets, table_pad, *, tile_n=4096, logits_dtype=jnp.bfloat16):
    """Mirrors BigramLanguageModel.forward(idx, targets).

    Returns (logits_padded, loss): logits_padded is (B*T, 128); the first
    `vocab_size` columns match PyTorch's logits.view(B*T, C) (exact table rows,
    cast to logits_dtype), the remaining columns hold NEG_INF.  loss is the scalar
    mean cross entropy (None when targets is None).  For training steps that never
    read the logits, call bigram_loss() instead — it skips the logits writeback.
    """
    if targets is None:
        return bigram_logits(idx, table_pad, tile_n=tile_n, logits_dtype=logits_dtype), None
    return _forward_with_loss(idx, targets, table_pad, tile_n=tile_n, logits_dtype=logits_dtype)


# ---------------------------------------------------------------------------
# Demo / correctness check
# ---------------------------------------------------------------------------

if __name__ == "__main__":
    # Small deterministic setup: vocab of 65 chars (tinyshakespeare-like), B=2, T=8.
    vocab_size = 65
    B, T = 2, 8

    key = jax.random.PRNGKey(0)
    k_table, k_idx, k_tgt = jax.random.split(key, 3)

    # nn.Embedding default init: N(0, 1).
    table = jax.random.normal(k_table, (vocab_size, vocab_size), dtype=jnp.float32)
    idx = jax.random.randint(k_idx, (B, T), 0, vocab_size, dtype=jnp.int32)
    targets = jax.random.randint(k_tgt, (B, T), 0, vocab_size, dtype=jnp.int32)

    # Pad the table once, outside the per-step path.
    table_pad = pad_embedding_table(table, vocab_size)

    # Full forward: bf16 logits + scalar loss.
    logits_bf16, loss = bigram_forward(idx, targets, table_pad)
    # Loss-only training fast path (no logits writeback).
    loss_only = bigram_loss(idx, targets, table_pad)
    # f32-logits variant (exact embedding rows) and inference path (targets=None).
    logits_f32, loss_f32 = bigram_forward(idx, targets, table_pad, logits_dtype=jnp.float32)
    logits_infer, no_loss = bigram_forward(idx, None, table_pad)
    jax.block_until_ready((logits_bf16, loss, loss_only, logits_f32, loss_f32, logits_infer))

    # Pure-JAX reference (the [:, :vocab_size] slice here is test-only; production
    # consumers read the padded logits directly).
    ref_logits = table[idx.reshape(-1)]
    ref_lse = jax.nn.logsumexp(ref_logits, axis=-1)
    ref_loss = jnp.mean(ref_lse - ref_logits[jnp.arange(B * T), targets.reshape(-1)])

    assert jnp.allclose(logits_f32[:, :vocab_size], ref_logits, atol=1e-5), "f32 logits mismatch"
    assert jnp.allclose(logits_bf16[:, :vocab_size].astype(jnp.float32), ref_logits,
                        atol=5e-2, rtol=2e-2), "bf16 logits mismatch"
    assert jnp.allclose(logits_infer[:, :vocab_size].astype(jnp.float32), ref_logits,
                        atol=5e-2, rtol=2e-2), "inference logits mismatch"
    assert no_loss is None
    assert jnp.allclose(loss, ref_loss, atol=1e-5), "loss mismatch (forward)"
    assert jnp.allclose(loss_f32, ref_loss, atol=1e-5), "loss mismatch (f32 forward)"
    assert jnp.allclose(loss_only, ref_loss, atol=1e-5), "loss mismatch (loss-only)"

    print("KERNEL_OK")
</pallas_src>

<mosaic_0001>
module attributes {stable_mosaic.version = 11 : i64} {
  func.func @_logits_loss_kernel(%arg0: i32, %arg1: memref<16x1xi32, #tpu.memory_space<vmem>>, %arg2: memref<16x1xi32, #tpu.memory_space<vmem>>, %arg3: memref<128x128xf32, #tpu.memory_space<vmem>>, %arg4: memref<16x128xbf16, #tpu.memory_space<vmem>>, %arg5: memref<8x128xf32, #tpu.memory_space<vmem>>) attributes {dimension_semantics = [#tpu.dimension_semantics<parallel>], iteration_bounds = array<i64: 1>, scalar_prefetch = 0 : i64, scratch_operands = 0 : i64, tpu.core_type = #tpu.core_type<tc>, window_params = [{transform_indices = @transform_0, window_bounds = array<i64: 16, 1>}, {transform_indices = @transform_1, window_bounds = array<i64: 16, 1>}, {pipeline_mode = #tpu.pipeline_mode<synchronous>, transform_indices = @transform_2, window_bounds = array<i64: 128, 128>}, {transform_indices = @transform_3, window_bounds = array<i64: 16, 128>}, {transform_indices = @transform_4, window_bounds = array<i64: 8, 128>}]} {
    %0 = tpu.iota {dimensions = array<i32: 1>} : vector<16x128xi32>
    %c0 = arith.constant 0 : index
    %c0_0 = arith.constant 0 : index
    %1 = vector.load %arg1[%c0, %c0_0] : memref<16x1xi32, #tpu.memory_space<vmem>>, vector<16x1xi32>
    %2 = vector.broadcast %1 : vector<16x1xi32> to vector<16x128xi32>
    %3 = arith.cmpi eq, %0, %2 : vector<16x128xi32>
    %4 = arith.extui %3 : vector<16x128xi1> to vector<16x128xi32>
    %5 = arith.sitofp %4 : vector<16x128xi32> to vector<16x128xf32>
    %c0_1 = arith.constant 0 : index
    %c0_2 = arith.constant 0 : index
    %6 = vector.load %arg3[%c0_1, %c0_2] : memref<128x128xf32, #tpu.memory_space<vmem>>, vector<128x128xf32>
    %cst = arith.constant dense<0.000000e+00> : vector<16x128xf32>
    %7 = tpu.matmul %5, %6, %cst {dimension_numbers = #tpu.dot_dimension_numbers<[1], [0], [0], [1], [0, 0, 1, 1], [], []>} : vector<16x128xf32>, vector<128x128xf32>, vector<16x128xf32> -> vector<16x128xf32>
    %cst_3 = arith.constant dense<0xFF800000> : vector<16xf32>
    %8 = vector.multi_reduction <maximumf>, %7, %cst_3 [1] : vector<16x128xf32> to vector<16xf32>
    %9 = vector.shape_cast %8 : vector<16xf32> to vector<16x1xf32>
    %10 = vector.broadcast %9 : vector<16x1xf32> to vector<16x128xf32>
    %11 = arith.subf %7, %10 : vector<16x128xf32>
    %12 = math.exp %11 : vector<16x128xf32>
    %cst_4 = arith.constant dense<0.000000e+00> : vector<16xf32>
    %13 = vector.multi_reduction <add>, %12, %cst_4 [1] : vector<16x128xf32> to vector<16xf32>
    %14 = vector.shape_cast %13 : vector<16xf32> to vector<16x1xf32>
    %15 = math.log %14 : vector<16x1xf32>
    %16 = arith.addf %9, %15 : vector<16x1xf32>
    %c0_5 = arith.constant 0 : index
    %c0_6 = arith.constant 0 : index
    %17 = vector.load %arg2[%c0_5, %c0_6] : memref<16x1xi32, #tpu.memory_space<vmem>>, vector<16x1xi32>
    %18 = vector.broadcast %17 : vector<16x1xi32> to vector<16x128xi32>
    %19 = arith.cmpi eq, %0, %18 : vector<16x128xi32>
    %cst_7 = arith.constant 0.000000e+00 : f32
    %20 = vector.broadcast %cst_7 : f32 to vector<16x128xf32>
    %21 = arith.select %19, %7, %20 : vector<16x128xi1>, vector<16x128xf32>
    %cst_8 = arith.constant dense<0.000000e+00> : vector<16xf32>
    %22 = vector.multi_reduction <add>, %21, %cst_8 [1] : vector<16x128xf32> to vector<16xf32>
    %23 = vector.shape_cast %22 : vector<16xf32> to vector<16x1xf32>
    %24 = arith.subf %16, %23 : vector<16x1xf32>
    %cst_9 = arith.constant dense<0.000000e+00> : vector<1xf32>
    %25 = vector.multi_reduction <add>, %24, %cst_9 [0] : vector<16x1xf32> to vector<1xf32>
    %26 = vector.shape_cast %25 : vector<1xf32> to vector<1x1xf32>
    %cst_10 = arith.constant 6.250000e-02 : f32
    %27 = vector.broadcast %cst_10 : f32 to vector<1x1xf32>
    %28 = arith.mulf %26, %27 : vector<1x1xf32>
    %29 = vector.shape_cast %28 : vector<1x1xf32> to vector<1x1xf32>
    %30 = vector.broadcast %29 : vector<1x1xf32> to vector<8x128xf32>
    %c0_11 = arith.constant 0 : index
    %c0_12 = arith.constant 0 : index
    %31 = vector.load %arg5[%c0_11, %c0_12] : memref<8x128xf32, #tpu.memory_space<vmem>>, vector<8x128xf32>
    tpu.vector_store %arg5[%c0_11, %c0_12], %30 {strides = array<i32>} : memref<8x128xf32, #tpu.memory_space<vmem>>, vector<8x128xf32>,
    %32 = arith.truncf %7 : vector<16x128xf32> to vector<16x128xbf16>
    %c0_13 = arith.constant 0 : index
    %c0_14 = arith.constant 0 : index
    %33 = vector.load %arg4[%c0_13, %c0_14] : memref<16x128xbf16, #tpu.memory_space<vmem>>, vector<16x128xbf16>
    tpu.vector_store %arg4[%c0_13, %c0_14], %32 {strides = array<i32>} : memref<16x128xbf16, #tpu.memory_space<vmem>>, vector<16x128xbf16>,
    return
  }
  func.func @transform_0(%arg0: i32) -> (i32, i32) {
    %c0_i32 = arith.constant 0 : i32
    %c0_i32_0 = arith.constant 0 : i32
    return %arg0, %c0_i32 : i32, i32
  }
  func.func @transform_1(%arg0: i32) -> (i32, i32) {
    %c0_i32 = arith.constant 0 : i32
    %c0_i32_0 = arith.constant 0 : i32
    return %arg0, %c0_i32 : i32, i32
  }
  func.func @transform_2(%arg0: i32) -> (i32, i32) {
    %c0_i32 = arith.constant 0 : i32
    %c0_i32_0 = arith.constant 0 : i32
    %c0_i32_1 = arith.constant 0 : i32
    return %c0_i32, %c0_i32_0 : i32, i32
  }
  func.func @transform_3(%arg0: i32) -> (i32, i32) {
    %c0_i32 = arith.constant 0 : i32
    %c0_i32_0 = arith.constant 0 : i32
    return %arg0, %c0_i32 : i32, i32
  }
  func.func @transform_4(%arg0: i32) -> (i32, i32) {
    %c0_i32 = arith.constant 0 : i32
    %c0_i32_0 = arith.constant 0 : i32
    return %arg0, %c0_i32 : i32, i32
  }
}

</mosaic_0001>

<bundles_post_ra>
// kernel: _forward_with_loss.1
= control target key start
LH: loop header
LB: loop body
LE: loop exit
PB: predicated region body
PF: predicated region fallthrough
CT: control target
= control target key end

     0   :  { %10 = vsyncpa [#allocation3], 0  ;;  %s311_s0 = inlined_call_operand.vmem [shape: s32[16,1], index: 0, kind: input, shape index: {}]   ;;  %s312_s1 = inlined_call_operand.vmem [shape: s32[16,1], index: 1, kind: input, shape index: {}]   ;;  %s313_s2 = inlined_call_operand.hbm [shape: f32[128,128], index: 2, kind: input, shape index: {}]   ;;  %s314_s3 = inlined_call_operand.hbm [shape: bf16[16,128], index: 3, kind: output, shape index: {0}]   ;;  %s315_s4 = inlined_call_operand.vmem [shape: f32[8,128], index: 4, kind: output, shape index: {1}]  }
   0x1   :  { %11 = vsyncpa [#allocation4], 0  ;;  %s20_s17 = sshll.u32 %s313_s2, 4  ;;  %s257_s18 = smov [#allocation2]   ;;  %s21_s17 = int_to_ptr.hbm [resolvable:$true] %s20_s17 }
   0x2   :  { %s22_s19 = sshll.u32 %s257_s18, 4  ;;  %s258_s20 = smov 128   ;;  %s23_s19 = int_to_ptr.vmem [resolvable:$true] %s22_s19 }
   0x3   :  { %s259_s21 = smov 8  }
   0x4   :  { %28 = dma.hbm_to_vmem [thread:$0]  %s21_s17, 2048, %s23_s19, [#allocation3], %s258_s20, %s258_s20, %s259_s21  }
   0x5   :  { %253 = dma.done.wait [#allocation3], 2048  }
   0x6   :  { %254 = vsyncadd [#allocation3], 4294965248  ;;  %v260_v0 = vmov 0   ;;  %v35_v1 = vld [vmem:[%s311_s0] sm:$0xff]  ;;  %v64_v2 = vld [vmem:[#allocation2 + $0x78] sm:$0xff]  ;;  %v33_v21 = vlaneseq  ;;  %v261_v24 = vmov 1.0  }
   0x7   :  { %195 = vset.pattern.permute.xlu0 %v260_v0  ;;  %196 = vset.pattern.permute.xlu2 %v260_v0  ;;  %v63_v3 = vld [vmem:[#allocation2 + $0x70] sm:$0xff]  ;;  %v62_v4 = vld [vmem:[#allocation2 + $0x68] sm:$0xff]  ;;  %v61_v5 = vld [vmem:[#allocation2 + $0x60] sm:$0xff]  ;;  %s145_s5 = sshll.u32 %s314_s3, 4  ;;  %s263_s6 = smov 64   ;;  %s146_s5 = int_to_ptr.hbm [resolvable:$true] %s145_s5 }
   0x8   :  { %38 = vperm.xlu0 %195, %v35_v1   ;;  %65 = vmatpush.msra.mxu0 %v64_v2  ;;  %v36_v6 = vld [vmem:[%s311_s0 + $0x8] sm:$0xff]  ;;  %v60_v7 = vld [vmem:[#allocation2 + $0x58] sm:$0xff]  ;;  %v59_v8 = vld [vmem:[#allocation2 + $0x50] sm:$0xff]  ;;  %v34_v22 = vand.u32 127, %v33_v21  ;;  %s264_s7 = smov 4  }
   0x9   :  { %171 = vmatpush.msra.mxu1 %v64_v2  ;;  %v58_v9 = vld [vmem:[#allocation2 + $0x48] sm:$0xff]  ;;  %v57_v10 = vld [vmem:[#allocation2 + $0x40] sm:$0xff]  ;;  %v56_v11 = vld [vmem:[#allocation2 + $0x38] sm:$0xff] }
   0xa   :  { %66 = vmatpush.msra.mxu0 %v63_v3  ;;  %v55_v12 = vld [vmem:[#allocation2 + $0x30] sm:$0xff]  ;;  %v54_v13 = vld [vmem:[#allocation2 + $0x28] sm:$0xff]  ;;  %v53_v14 = vld [vmem:[#allocation2 + $0x20] sm:$0xff] }
   0xb   :  { %172 = vmatpush.msra.mxu1 %v63_v3  ;;  %v52_v15 = vld [vmem:[#allocation2 + $0x18] sm:$0xff]  ;;  %v51_v16 = vld [vmem:[#allocation2 + $0x10] sm:$0xff]  ;;  %v50_v17 = vld [vmem:[#allocation2 + $0x8] sm:$0xff] }
   0xc   :  { %67 = vmatpush.msra.mxu0 %v62_v4  ;;  %v49_v18 = vld [vmem:[#allocation2] sm:$0xff]  ;;  %v109_v20 = vld [vmem:[%s312_s1 + $0x8] sm:$0xff] }
   0xd   :  { %173 = vmatpush.msra.mxu1 %v62_v4  ;;  %v108_v19 = vld [vmem:[%s312_s1] sm:$0xff]  ;;  %s262_s1 = smov [#allocation5]  }
   0xe   :  { %68 = vmatpush.msra.mxu0 %v61_v5  ;;  %111 = vperm.xlu2 %196, %v108_v19   ;;  %s143_s28 = sshll.u32 %s262_s1, 4  ;;  %s144_s28 = int_to_ptr.vmem [resolvable:$true] %s143_s28 }
   0xf   :  { %174 = vmatpush.msra.mxu1 %v61_v5 }
  0x10   :  { %41 = vperm.xlu0 %195, %v36_v6   ;;  %69 = vmatpush.msra.mxu0 %v60_v7 }
  0x11   :  { %175 = vmatpush.msra.mxu1 %v60_v7 }
  0x12   :  { %70 = vmatpush.msra.mxu0 %v59_v8 }
  0x13   :  { %176 = vmatpush.msra.mxu1 %v59_v8 }
  0x14   :  { %71 = vmatpush.msra.mxu0 %v58_v9 }
  0x15   :  { %177 = vmatpush.msra.mxu1 %v58_v9 }
  0x16   :  { %72 = vmatpush.msra.mxu0 %v57_v10  ;;  %114 = vperm.xlu2 %196, %v109_v20  }
  0x17   :  { %178 = vmatpush.msra.mxu1 %v57_v10 }
  0x18   :  { %73 = vmatpush.msra.mxu0 %v56_v11 }
  0x19   :  { %179 = vmatpush.msra.mxu1 %v56_v11 }
  0x1a   :  { %74 = vmatpush.msra.mxu0 %v55_v12 }
  0x1b   :  { %180 = vmatpush.msra.mxu1 %v55_v12 }
  0x1c   :  { %75 = vmatpush.msra.mxu0 %v54_v13 }
  0x1d   :  { %181 = vmatpush.msra.mxu1 %v54_v13 }
  0x1e   :  { %76 = vmatpush.msra.mxu0 %v53_v14 }
  0x1f   :  { %182 = vmatpush.msra.mxu1 %v53_v14 }
  0x20   :  { %77 = vmatpush.msra.mxu0 %v52_v15 }
  0x21   :  { %183 = vmatpush.msra.mxu1 %v52_v15 }
  0x22   :  { %78 = vmatpush.msra.mxu0 %v51_v16 }
  0x23   :  { %184 = vmatpush.msra.mxu1 %v51_v16 }
  0x24   :  { %79 = vmatpush.msra.mxu0 %v50_v17 }
  0x25   :  { %185 = vmatpush.msra.mxu1 %v50_v17 }
  0x26   :  { %80 = vmatpush.msra.mxu0 %v49_v18 }
  0x27   :  { %186 = vmatpush.msra.mxu1 %v49_v18 }
  0x68   :  { %v112_v26 = vpop.permute.xlu2 %111 }
  0x69   :  { %vm116_vm2 = vcmp.eq.s32.totalorder %v34_v22, %v112_v26 }
  0x70   :  { %v115_v39 = vpop.permute.xlu2 %114 }
  0x71   :  { %vm117_vm3 = vcmp.eq.s32.totalorder %v34_v22, %v115_v39 }
  0x7a   :  { %v39_v23 = vpop.permute.xlu0 %38 }
  0x7b   :  { %vm43_vm0 = vcmp.eq.s32.totalorder %v34_v22, %v39_v23 }
  0x7c   :  { %164 = vmatmul.msk.f32.vlgmr.msra.gmra.mxu0 %vm43_vm0, %v261_v24 }
  0x82   :  { %v42_v25 = vpop.permute.xlu0 %41 }
  0x83   :  { %vm44_vm1 = vcmp.eq.s32.totalorder %v34_v22, %v42_v25 }
  0x84   :  { %165 = vmatmul.msk.f32.vlgmr.msra.gmra.mxu1 %vm44_vm1, %v261_v24 }
  0xf9   :  { %v82_v27 = vpop.f32.mrf.mxu0 }
  0xfa   :  { %88 = vmax.xlane.f32.xlu1 %v82_v27  ;;  %v118_v28 = vsel %vm116_vm2, %v82_v27, 0.0 }
  0xfb   :  { %120 = vadd.xlane.f32.xlu2 %v118_v28 }
 0x101   :  { %v85_v29 = vpop.f32.mrf.mxu1 }
 0x102   :  { %v169_v30 = vpack.c.bf16 %v85_v29, %v82_v27  ;;  %90 = vmax.xlane.f32.xlu1 %v85_v29  ;;  %v119_v40 = vsel %vm117_vm3, %v85_v29, 0.0 }
 0x104   :  { %170 = vst [vmem:[#allocation5] sm:$0xff] %v169_v30  }
 0x105   :  { %151 = dma.vmem_to_hbm [thread:$0]  %s144_s28, 128, %s146_s5, [#allocation4], %s263_s6, %s263_s6, %s264_s7  }
 0x16d   :  { %v89_v31 = vpop.xlane.xlu1 %88 }
 0x16e   :  { %v92_v32 = vsub.f32 %v82_v27, %v89_v31  ;;  %v121_v49 = vpop.xlane.xlu2 %120 }
 0x170   :  { %v94_v33 = vmul.f32 1.442695, %v92_v32 }
 0x172   :  { %197 = vpow2.f32 %v94_v33 }
 0x175   :  { %v91_v34 = vpop.xlane.xlu1 %90 }
 0x176   :  { %v93_v35 = vsub.f32 %v85_v29, %v91_v34 }
 0x178   :  { %v198_v36 = vpop.eup %197  ;;  %v96_v37 = vmul.f32 1.442695, %v93_v35 }
 0x179   :  { %98 = vadd.xlane.f32.xlu0 %v198_v36 }
 0x17a   :  { %199 = vpow2.f32 %v96_v37 }
 0x180   :  { %v200_v38 = vpop.eup %199 }
 0x181   :  { %100 = vadd.xlane.f32.xlu1 %v200_v38 }
 0x189   :  { %122 = vadd.xlane.f32.xlu1 %v119_v40 }
 0x1ec   :  { %v99_v41 = vpop.xlane.xlu0 %98 }
 0x1ed   :  { %201 = vlog2.f32 %v99_v41 }
 0x1f3   :  { %v202_v43 = vpop.eup %201 }
 0x1f4   :  { %v101_v42 = vpop.xlane.xlu1 %100  ;;  %v103_v44 = vmul.f32 0.6931472, %v202_v43 }
 0x1f5   :  { %203 = vlog2.f32 %v101_v42 }
 0x1f6   :  { %v106_v46 = vadd.f32 %v103_v44, %v89_v31 }
 0x1f8   :  { %v124_v51 = vsub.f32 %v106_v46, %v121_v49 }
 0x1fb   :  { %v204_v45 = vpop.eup %203 }
 0x1fc   :  { %v105_v47 = vmul.f32 0.6931472, %v204_v45  ;;  %v123_v50 = vpop.xlane.xlu1 %122 }
 0x1fe   :  { %v107_v48 = vadd.f32 %v105_v47, %v91_v34 }
 0x200   :  { %v125_v52 = vsub.f32 %v107_v48, %v123_v50 }
 0x202   :  { %v126_v53 = vadd.f32 %v125_v52, %v124_v51 }
 0x204   :  { %v127_v54 = vrot.slane %v126_v53, 4 }
 0x206   :  { %v128_v55 = vadd.f32 %v127_v54, %v126_v53 }
 0x208   :  { %v129_v56 = vrot.slane %v128_v55, 2 }
 0x20a   :  { %v130_v57 = vadd.f32 %v129_v56, %v128_v55 }
 0x20c   :  { %v131_v58 = vrot.slane %v130_v57, 1 }
 0x20e   :  { %v132_v59 = vadd.f32 %v131_v58, %v130_v57 }
 0x210   :  { %v133_v60 = vmul.f32 0.0625, %v132_v59 }
 0x212   :  { %134 = vst [vmem:[%s315_s4] sm:$0xff] %v133_v60 }
 0x213   :  { %255 = dma.done.wait [#allocation4], 128  }
 0x214   :  { %256 = vsyncadd [#allocation4], 4294967168 }
 0x215   :  { %160 = vsyncpa [#allocation3], 1 }
 0x216   :  { %161 = vsyncpa [#allocation4], 1 }

</bundles_post_ra>
